<compile_context>
chip_gen: v5e
topology: v5e:2x2
jax: 0.10.0
libtpu: 0.0.40
codegen_flags: <defaults>
</compile_context>

<pallas_src>
import jax
import jax.numpy as jnp
from jax.experimental import pallas as pl
from jax.experimental.pallas import tpu as pltpu


def cat_tanh_kernel(x_ref, o_ref):
    # x_ref: (tb, tn) input tile; o_ref: (tb, 2, tn) duplicated output tile.
    t = jnp.tanh(x_ref[...]).astype(o_ref.dtype)          # EUP transcendental
    # One broadcast along the (sublane-side) duplicate axis + one store.
    o_ref[...] = jnp.broadcast_to(t[:, None, :], o_ref.shape)


def _pick_tile(extent, target, align):
    """Largest multiple of `align` <= target that divides `extent`.

    Falls back to the full extent (legal: block dim == full array dim) when the
    extent is not a multiple of `align`.
    """
    if extent % align != 0:
        return extent
    t = min(target, extent)
    t = (t // align) * align
    while t > 0 and extent % t != 0:
        t -= align
    return t if t > 0 else extent


def cat_tanh_duplicated(x, *, row_target=256, lane_target=1024):
    """Returns tanh(cat((x, x), dim=1)) for x of shape (B, C, W)."""
    B, C, W = x.shape
    N = C * W
    x2 = x.reshape(B, N)                       # free row-major view

    tb = _pick_tile(B, row_target, 8)          # sublane-side row tile
    tn = _pick_tile(N, lane_target, 128)       # lane tile (multiple of 128 when possible)
    grid = (B // tb, N // tn)

    out = pl.pallas_call(
        cat_tanh_kernel,
        out_shape=jax.ShapeDtypeStruct((B, 2, N), x.dtype),
        grid=grid,
        in_specs=[pl.BlockSpec((tb, tn), lambda i, j: (i, j))],
        # Last two dims of the output block are (2, tn): 2 == full array dim,
        # tn is 128-aligned or the full extent — satisfies the (8,128) rule.
        out_specs=pl.BlockSpec((tb, 2, tn), lambda i, j: (i, 0, j)),
        compiler_params=pltpu.CompilerParams(
            dimension_semantics=("parallel", "parallel")),
    )(x2)

    # (B, 2, C*W) -> (B, 2*C, W): pure row-major reshape, no transpose / copy.
    # out[b, j, c*W + w] == result[b, j*C + c, w] == tanh(x[b, c, w]).
    return out.reshape(B, 2 * C, W)


def model_forward(x):
    """Mirrors Model.forward.

    y = cat((x, x), dim=1); then (if batch==1) flatten before tanh, else tanh.
    tanh is elementwise, so the batch==1 flatten is just a reshape of the same
    kernel output.
    """
    B = x.shape[0]
    y_tanh = cat_tanh_duplicated(x)   # (B, 2C, W), tanh applied in-kernel
    if B == 1:
        out = y_tanh.reshape(B, -1)   # y.view(B, -1).tanh() branch
    else:
        out = y_tanh                  # y.tanh() branch
    # TODO(synk): the original `x.view(x.shape[0])` is invalid for this input
    # (48 elements cannot be viewed as shape (2,)) and raises in PyTorch; the
    # valid portion of the forward (cat + tanh) is returned instead.
    return out


if __name__ == "__main__":
    key = jax.random.PRNGKey(0)

    # Spec-sized input (tiny, unaligned -> single full-extent block path).
    x_small = jax.random.normal(key, (2, 3, 4), dtype=jnp.float32)
    out_small = model_forward(x_small)
    jax.block_until_ready(out_small)
    ref_small = jnp.tanh(jnp.concatenate([x_small, x_small], axis=1))
    assert out_small.shape == (2, 6, 4)
    assert jnp.allclose(out_small, ref_small, atol=1e-6)

    # Aligned, moderately larger input to exercise the gridded, lane-dense path.
    x_big = jax.random.normal(jax.random.PRNGKey(1), (16, 8, 256), dtype=jnp.float32)
    out_big = model_forward(x_big)
    jax.block_until_ready(out_big)
    ref_big = jnp.tanh(jnp.concatenate([x_big, x_big], axis=1))
    assert out_big.shape == (16, 16, 256)
    assert jnp.allclose(out_big, ref_big, atol=1e-6)

    print("KERNEL_OK")
</pallas_src>

<mosaic_0001>
module attributes {stable_mosaic.version = 11 : i64} {
  func.func @cat_tanh_kernel(%arg0: i32, %arg1: i32, %arg2: memref<2x12xf32, #tpu.memory_space<vmem>>, %arg3: memref<2x2x12xf32, #tpu.memory_space<vmem>>) attributes {dimension_semantics = [#tpu.dimension_semantics<parallel>, #tpu.dimension_semantics<parallel>], iteration_bounds = array<i64: 1, 1>, scalar_prefetch = 0 : i64, scratch_operands = 0 : i64, tpu.core_type = #tpu.core_type<tc>, window_params = [{transform_indices = @transform_0, window_bounds = array<i64: 2, 12>}, {transform_indices = @transform_1, window_bounds = array<i64: 2, 2, 12>}]} {
    %c0 = arith.constant 0 : index
    %c0_0 = arith.constant 0 : index
    %0 = vector.load %arg2[%c0, %c0_0] : memref<2x12xf32, #tpu.memory_space<vmem>>, vector<2x12xf32>
    %1 = math.tanh %0 : vector<2x12xf32>
    %2 = vector.shape_cast %1 : vector<2x12xf32> to vector<2x1x12xf32>
    %3 = vector.shape_cast %2 : vector<2x1x12xf32> to vector<2x1x12xf32>
    %4 = vector.broadcast %3 : vector<2x1x12xf32> to vector<2x2x12xf32>
    %c0_1 = arith.constant 0 : index
    %c0_2 = arith.constant 0 : index
    %c0_3 = arith.constant 0 : index
    %5 = vector.load %arg3[%c0_1, %c0_2, %c0_3] : memref<2x2x12xf32, #tpu.memory_space<vmem>>, vector<2x2x12xf32>
    tpu.vector_store %arg3[%c0_1, %c0_2, %c0_3], %4 {strides = array<i32>} : memref<2x2x12xf32, #tpu.memory_space<vmem>>, vector<2x2x12xf32>,
    return
  }
  func.func @transform_0(%arg0: i32, %arg1: i32) -> (i32, i32) {
    %c0_i32 = arith.constant 0 : i32
    return %arg0, %arg1 : i32, i32
  }
  func.func @transform_1(%arg0: i32, %arg1: i32) -> (i32, i32, i32) {
    %c0_i32 = arith.constant 0 : i32
    %c0_i32_0 = arith.constant 0 : i32
    return %arg0, %c0_i32, %arg1 : i32, i32, i32
  }
}

</mosaic_0001>

<bundles_post_ra>
// kernel: tpu_custom_call.1
= control target key start
LH: loop header
LB: loop body
LE: loop exit
PB: predicated region body
PF: predicated region fallthrough
CT: control target
= control target key end

     0   :  { %6 = vsyncpa [#allocation3], 0  ;;  %s131_s0 = inlined_call_operand.hbm [shape: f32[2,12], index: 0, kind: input, shape index: {}]   ;;  %s132_s1 = inlined_call_operand.hbm [shape: f32[2,2,12], index: 1, kind: output, shape index: {}]  }
   0x1   :  { %7 = vsyncpa [#allocation4], 0  ;;  %s13_s8 = sshll.u32 %s131_s0, 4  ;;  %s111_s9 = smov [#allocation2]   ;;  %s14_s8 = int_to_ptr.hbm [resolvable:$true] %s13_s8 }
   0x2   :  { %s15_s10 = sshll.u32 %s111_s9, 4  ;;  %s16_s10 = int_to_ptr.vmem [resolvable:$true] %s15_s10 }
   0x3   :  { %18 = dma.hbm_to_vmem [thread:$0]  %s14_s8, 32, %s16_s10, [#allocation3]  }
   0x4   :  { %107 = dma.done.wait [#allocation3], 32  }
   0x5   :  { %108 = vsyncadd [#allocation3], 4294967264  ;;  %v23_v0 = vld [vmem:[#allocation2] sm:$0x3]  ;;  %s112_s11 = smov [#allocation5]   ;;  %s40_s15 = sshll.u32 %s132_s1, 4  ;;  %s41_s15 = int_to_ptr.hbm [resolvable:$true] %s40_s15 }
   0x6   :  { %57 = vtanh.f32 %v23_v0  ;;  %s38_s12 = sshll.u32 %s112_s11, 4  ;;  %vm31_vm0 = vcmask 91136   ;;  %s113_s0 = smov 32   ;;  %s39_s12 = int_to_ptr.vmem [resolvable:$true] %s38_s12 }
   0x7   :  { %s114_s16 = smov 2  }
   0xc   :  { %v58_v1 = vpop.eup %57 }
   0xd   :  { %v27_v2 = vperm.slane %v58_v1, 0  ;;  %v26_v3 = vrot.slane %v58_v1, 1 }
   0xf   :  { %32 = vst.msk [vmem:[#allocation5] sm:$0x3] %vm31_vm0, %v27_v2  ;;  %v28_v4 = vperm.slane %v26_v3, 0 }
  0x11   :  { %33 = vst.msk [vmem:[#allocation5 + $0x2] sm:$0x3] %vm31_vm0, %v28_v4 }
  0x12   :  { %46 = dma.vmem_to_hbm [thread:$0]  %s39_s12, 64, %s41_s15, [#allocation4], %s113_s0, %s113_s0, %s114_s16  }
  0x13   :  { %109 = dma.done.wait [#allocation4], 64  }
  0x14   :  { %110 = vsyncadd [#allocation4], 4294967232 }
  0x15   :  { %51 = vsyncpa [#allocation3], 1 }
  0x16   :  { %52 = vsyncpa [#allocation4], 1 }

</bundles_post_ra>
